<compile_context>
chip_gen: v7x
topology: tpu7x:2x2x1
jax: 0.10.0
libtpu: 0.0.40
codegen_flags: <defaults>
</compile_context>

<pallas_src>
import math

import jax
import jax.numpy as jnp
from jax import lax
from jax.experimental import pallas as pl
from jax.experimental.pallas import tpu as pltpu

N_IN = 12
N_HIDDEN = 16
N_OUT = 8


def _new_gelu(x):
    # 0.5 * x * (1 + tanh(sqrt(2/pi) * (x + 0.044715 * x^3)))
    c = math.sqrt(2.0 / math.pi)
    return 0.5 * x * (1.0 + jnp.tanh(c * (x + 0.044715 * (x * x * x))))


def toy_model_kernel(x_ref, w1_ref, b1_ref, w2_ref, b2_ref, o_ref):
    # x_ref : (TILE_B, N_IN)    -- natural layout straight from HBM (no wrapper x.T)
    # w1_ref: (N_HIDDEN, N_IN)  -- PyTorch (out, in) layout, VMEM resident
    # b1_ref: (N_HIDDEN, 1) f32
    # w2_ref: (N_OUT, N_HIDDEN)
    # b2_ref: (N_OUT, 1) f32
    # o_ref : (N_OUT, TILE_B)   -- lane-dense output block (batch on the 128-lane axis)
    x = x_ref[...]
    # h[o, b] = sum_i W1[o, i] * x[b, i]   (contract both minor dims: q @ k.T pattern,
    # big dim stays on the MXU's N side; result is lane-dense over the batch).
    h = lax.dot_general(
        w1_ref[...], x, (((1,), (1,)), ((), ())), preferred_element_type=jnp.float32
    )
    h = h + b1_ref[...]                       # (N_HIDDEN, TILE_B), f32
    h = _new_gelu(h)                          # GELU in f32 on full-width vregs
    h = h.astype(w2_ref.dtype)                # native MXU pass when weights are bf16
    # y[o, b] = sum_k W2[o, k] * h[k, b]  -> (N_OUT, TILE_B), f32 accumulation.
    y = lax.dot_general(
        w2_ref[...], h, (((1,), (0,)), ((), ())), preferred_element_type=jnp.float32
    )
    o_ref[...] = (y + b2_ref[...]).astype(o_ref.dtype)


def _pick_tiling(batch):
    """Return (tile_b, n_tiles) for the 1-D batch grid."""
    if batch <= 512:
        # Tiny batch: one block covering the whole array (block dims == array dims,
        # so the (8,128) divisibility rule is satisfied and there is no padding).
        return batch, 1
    cap = 8192  # keeps double-buffered VMEM (incl. lane padding of the x block) <= ~16 MiB
    # Even tile count >= 2 -> both v7x TensorCores get balanced work; no-op on v5e/v6e.
    n_target = 2 * max(1, math.ceil(batch / (2 * cap)))
    tile_b = min(cap, 128 * math.ceil(batch / (n_target * 128)))
    n_tiles = math.ceil(batch / tile_b)
    return tile_b, n_tiles


def toy_model_forward(x, w1, b1, w2, b2):
    """x: (B, N_IN); w1: (N_HIDDEN, N_IN); b1: (N_HIDDEN,); w2: (N_OUT, N_HIDDEN);
    b2: (N_OUT,)  ->  (B, N_OUT).  Weight layout matches PyTorch nn.Linear."""
    B = x.shape[0]
    tile_b, n_tiles = _pick_tiling(B)

    b1c = b1.reshape(N_HIDDEN, 1).astype(jnp.float32)
    b2c = b2.reshape(N_OUT, 1).astype(jnp.float32)

    act_itemsize = jnp.dtype(x.dtype).itemsize
    w_itemsize = jnp.dtype(w1.dtype).itemsize
    rows = n_tiles * tile_b  # rows actually streamed through the pipeline (incl. ragged pad)
    cost = pl.CostEstimate(
        flops=2 * rows * (N_IN * N_HIDDEN + N_HIDDEN * N_OUT),
        transcendentals=rows * N_HIDDEN,
        bytes_accessed=rows * (N_IN + N_OUT) * act_itemsize
        + (w1.size + w2.size) * w_itemsize
        + (N_HIDDEN + N_OUT) * 4,
    )

    yT = pl.pallas_call(
        toy_model_kernel,
        out_shape=jax.ShapeDtypeStruct((N_OUT, B), x.dtype),
        grid=(n_tiles,),
        in_specs=[
            pl.BlockSpec((tile_b, N_IN), lambda i: (i, 0)),      # x tile (pipelined)
            pl.BlockSpec((N_HIDDEN, N_IN), lambda i: (0, 0)),    # W1 resident
            pl.BlockSpec((N_HIDDEN, 1), lambda i: (0, 0)),       # b1 resident
            pl.BlockSpec((N_OUT, N_HIDDEN), lambda i: (0, 0)),   # W2 resident
            pl.BlockSpec((N_OUT, 1), lambda i: (0, 0)),          # b2 resident
        ],
        out_specs=pl.BlockSpec((N_OUT, tile_b), lambda i: (0, i)),  # lane-dense output
        compiler_params=pltpu.CompilerParams(
            dimension_semantics=("parallel",),        # megacore split on v7x
            vmem_limit_bytes=32 * 1024 * 1024,        # headroom on v5e (16 MiB default)
        ),
        cost_estimate=cost,
    )(x, w1, b1c, w2, b2c)

    # Single remaining layout op: (N_OUT, B) -> (B, N_OUT), ~64 B/row at full HBM BW.
    # Cheaper in slot time than masked 8-of-128-lane stores inside the kernel.
    return yT.T


def init_params(key):
    """Deterministic params mimicking nn.Linear's U(-1/sqrt(fan_in), 1/sqrt(fan_in)),
    stored in PyTorch layout: weight (out, in), bias (out,)."""
    k1, k2, k3, k4 = jax.random.split(key, 4)
    bound1 = 1.0 / math.sqrt(N_IN)
    bound2 = 1.0 / math.sqrt(N_HIDDEN)
    w1 = jax.random.uniform(k1, (N_HIDDEN, N_IN), jnp.float32, -bound1, bound1)
    b1 = jax.random.uniform(k2, (N_HIDDEN,), jnp.float32, -bound1, bound1)
    w2 = jax.random.uniform(k3, (N_OUT, N_HIDDEN), jnp.float32, -bound2, bound2)
    b2 = jax.random.uniform(k4, (N_OUT,), jnp.float32, -bound2, bound2)
    return w1, b1, w2, b2


def reference_forward(x, w1, b1, w2, b2):
    h = _new_gelu(x @ w1.T + b1)
    return h @ w2.T + b2


if __name__ == "__main__":
    key = jax.random.PRNGKey(0)
    kx, kp = jax.random.split(key)
    w1, b1, w2, b2 = init_params(kp)
    fwd = jax.jit(toy_model_forward)

    ok = True
    # f32: tiny (single-block), medium single-block, ragged 2-tile (512+488),
    # and a larger evenly-split 2-tile batch (2 x 2048, balanced for v7x).
    for batch in (8, 300, 1000, 4096):
        x = jax.random.normal(jax.random.fold_in(kx, batch), (batch, N_IN), jnp.float32)
        out = jax.block_until_ready(fwd(x, w1, b1, w2, b2))
        ref = reference_forward(x, w1, b1, w2, b2)
        assert out.shape == (batch, N_OUT), out.shape
        if not bool(jnp.allclose(out, ref, atol=2e-5, rtol=2e-5)):
            ok = False
            err = float(jnp.max(jnp.abs(out - ref)))
            print(f"MISMATCH f32 batch={batch}: max abs err {err}")

    # bf16 activations + weights (f32 accumulation and f32 GELU inside the kernel).
    batch = 4096
    xb = jax.random.normal(jax.random.fold_in(kx, 99), (batch, N_IN), jnp.float32)
    out_bf = jax.block_until_ready(
        fwd(
            xb.astype(jnp.bfloat16),
            w1.astype(jnp.bfloat16),
            b1,
            w2.astype(jnp.bfloat16),
            b2,
        )
    )
    ref_bf = reference_forward(xb, w1, b1, w2, b2)
    if not bool(
        jnp.allclose(out_bf.astype(jnp.float32), ref_bf, atol=5e-2, rtol=5e-2)
    ):
        ok = False
        err = float(jnp.max(jnp.abs(out_bf.astype(jnp.float32) - ref_bf)))
        print(f"MISMATCH bf16 batch={batch}: max abs err {err}")

    if ok:
        print("KERNEL_OK")
</pallas_src>

<mosaic_0001>
module attributes {stable_mosaic.version = 11 : i64} {
  func.func @toy_model_kernel(%arg0: i32, %arg1: memref<8x12xf32, #tpu.memory_space<vmem>>, %arg2: memref<16x12xf32, #tpu.memory_space<vmem>>, %arg3: memref<16x1xf32, #tpu.memory_space<vmem>>, %arg4: memref<8x16xf32, #tpu.memory_space<vmem>>, %arg5: memref<8x1xf32, #tpu.memory_space<vmem>>, %arg6: memref<8x8xf32, #tpu.memory_space<vmem>>) attributes {dimension_semantics = [#tpu.dimension_semantics<parallel>], iteration_bounds = array<i64: 1>, scalar_prefetch = 0 : i64, scratch_operands = 0 : i64, tpu.core_type = #tpu.core_type<tc>, window_params = [{transform_indices = @transform_0, window_bounds = array<i64: 8, 12>}, {pipeline_mode = #tpu.pipeline_mode<synchronous>, transform_indices = @transform_1, window_bounds = array<i64: 16, 12>}, {pipeline_mode = #tpu.pipeline_mode<synchronous>, transform_indices = @transform_2, window_bounds = array<i64: 16, 1>}, {pipeline_mode = #tpu.pipeline_mode<synchronous>, transform_indices = @transform_3, window_bounds = array<i64: 8, 16>}, {pipeline_mode = #tpu.pipeline_mode<synchronous>, transform_indices = @transform_4, window_bounds = array<i64: 8, 1>}, {transform_indices = @transform_5, window_bounds = array<i64: 8, 8>}]} {
    %c0 = arith.constant 0 : index
    %c0_0 = arith.constant 0 : index
    %0 = vector.load %arg1[%c0, %c0_0] : memref<8x12xf32, #tpu.memory_space<vmem>>, vector<8x12xf32>
    %c0_1 = arith.constant 0 : index
    %c0_2 = arith.constant 0 : index
    %1 = vector.load %arg2[%c0_1, %c0_2] : memref<16x12xf32, #tpu.memory_space<vmem>>, vector<16x12xf32>
    %cst = arith.constant dense<0.000000e+00> : vector<16x8xf32>
    %2 = tpu.matmul %1, %0, %cst {dimension_numbers = #tpu.dot_dimension_numbers<[1], [1], [0], [0], [0, 0, 1, 0], [], []>} : vector<16x12xf32>, vector<8x12xf32>, vector<16x8xf32> -> vector<16x8xf32>
    %c0_3 = arith.constant 0 : index
    %c0_4 = arith.constant 0 : index
    %3 = vector.load %arg3[%c0_3, %c0_4] : memref<16x1xf32, #tpu.memory_space<vmem>>, vector<16x1xf32>
    %4 = vector.broadcast %3 : vector<16x1xf32> to vector<16x8xf32>
    %5 = arith.addf %2, %4 : vector<16x8xf32>
    %cst_5 = arith.constant 5.000000e-01 : f32
    %6 = vector.broadcast %cst_5 : f32 to vector<16x8xf32>
    %7 = arith.mulf %6, %5 : vector<16x8xf32>
    %8 = arith.mulf %5, %5 : vector<16x8xf32>
    %9 = arith.mulf %8, %5 : vector<16x8xf32>
    %cst_6 = arith.constant 4.471500e-02 : f32
    %10 = vector.broadcast %cst_6 : f32 to vector<16x8xf32>
    %11 = arith.mulf %10, %9 : vector<16x8xf32>
    %12 = arith.addf %5, %11 : vector<16x8xf32>
    %cst_7 = arith.constant 0.797884583 : f32
    %13 = vector.broadcast %cst_7 : f32 to vector<16x8xf32>
    %14 = arith.mulf %13, %12 : vector<16x8xf32>
    %15 = math.tanh %14 : vector<16x8xf32>
    %cst_8 = arith.constant 1.000000e+00 : f32
    %16 = vector.broadcast %cst_8 : f32 to vector<16x8xf32>
    %17 = arith.addf %16, %15 : vector<16x8xf32>
    %18 = arith.mulf %7, %17 : vector<16x8xf32>
    %c0_9 = arith.constant 0 : index
    %c0_10 = arith.constant 0 : index
    %19 = vector.load %arg4[%c0_9, %c0_10] : memref<8x16xf32, #tpu.memory_space<vmem>>, vector<8x16xf32>
    %cst_11 = arith.constant dense<0.000000e+00> : vector<8x8xf32>
    %20 = tpu.matmul %19, %18, %cst_11 {dimension_numbers = #tpu.dot_dimension_numbers<[1], [0], [0], [1], [0, 0, 1, 1], [], []>} : vector<8x16xf32>, vector<16x8xf32>, vector<8x8xf32> -> vector<8x8xf32>
    %c0_12 = arith.constant 0 : index
    %c0_13 = arith.constant 0 : index
    %21 = vector.load %arg5[%c0_12, %c0_13] : memref<8x1xf32, #tpu.memory_space<vmem>>, vector<8x1xf32>
    %22 = vector.broadcast %21 : vector<8x1xf32> to vector<8x8xf32>
    %23 = arith.addf %20, %22 : vector<8x8xf32>
    %c0_14 = arith.constant 0 : index
    %c0_15 = arith.constant 0 : index
    %24 = vector.load %arg6[%c0_14, %c0_15] : memref<8x8xf32, #tpu.memory_space<vmem>>, vector<8x8xf32>
    tpu.vector_store %arg6[%c0_14, %c0_15], %23 {strides = array<i32>} : memref<8x8xf32, #tpu.memory_space<vmem>>, vector<8x8xf32>,
    return
  }
  func.func @transform_0(%arg0: i32) -> (i32, i32) {
    %c0_i32 = arith.constant 0 : i32
    %c0_i32_0 = arith.constant 0 : i32
    return %arg0, %c0_i32 : i32, i32
  }
  func.func @transform_1(%arg0: i32) -> (i32, i32) {
    %c0_i32 = arith.constant 0 : i32
    %c0_i32_0 = arith.constant 0 : i32
    %c0_i32_1 = arith.constant 0 : i32
    return %c0_i32, %c0_i32_0 : i32, i32
  }
  func.func @transform_2(%arg0: i32) -> (i32, i32) {
    %c0_i32 = arith.constant 0 : i32
    %c0_i32_0 = arith.constant 0 : i32
    %c0_i32_1 = arith.constant 0 : i32
    return %c0_i32, %c0_i32_0 : i32, i32
  }
  func.func @transform_3(%arg0: i32) -> (i32, i32) {
    %c0_i32 = arith.constant 0 : i32
    %c0_i32_0 = arith.constant 0 : i32
    %c0_i32_1 = arith.constant 0 : i32
    return %c0_i32, %c0_i32_0 : i32, i32
  }
  func.func @transform_4(%arg0: i32) -> (i32, i32) {
    %c0_i32 = arith.constant 0 : i32
    %c0_i32_0 = arith.constant 0 : i32
    %c0_i32_1 = arith.constant 0 : i32
    return %c0_i32, %c0_i32_0 : i32, i32
  }
  func.func @transform_5(%arg0: i32) -> (i32, i32) {
    %c0_i32 = arith.constant 0 : i32
    %c0_i32_0 = arith.constant 0 : i32
    return %c0_i32, %arg0 : i32, i32
  }
}

</mosaic_0001>

<bundles_post_ra>
// kernel: toy_model_forward.1
= control target key start
LH: loop header
LB: loop body
LE: loop exit
PB: predicated region body
PF: predicated region fallthrough
CT: control target
= control target key end

     0   :  { %vm35_vm0 = vcmask 97280   ;;  %v260_v2 = vmov 0   ;;  %v261_v6 = vmov 0.0|0.0   ;;  %vm262_vm1 = vmmov 0   ;;  %s318_s0 = inlined_call_operand.vmem [shape: f32[8,12], index: 0, kind: input, shape index: {}]   ;;  %s319_s1 = inlined_call_operand.vmem [shape: f32[16,12], index: 1, kind: input, shape index: {}]   ;;  %s320_s2 = inlined_call_operand.vmem [shape: f32[16,1], index: 2, kind: input, shape index: {}]   ;;  %s321_s4 = inlined_call_operand.vmem [shape: f32[8,1], index: 4, kind: input, shape index: {}]   ;;  %s322_s3 = inlined_call_operand.vmem [shape: f32[8,16], index: 3, kind: input, shape index: {}]   ;;  %s323_s5 = inlined_call_operand.vmem [shape: f32[8,8], index: 5, kind: output, shape index: {}]  }
   0x1   :  { %v20_v0 = vld [vmem:[%s318_s0] sm:$0xff]  ;;  %254 = vset.pattern.permute.xlu0 %v260_v2  ;;  %255 = vset.pattern.permute.xlu1 %v260_v2  ;;  %v22_v4 = vld [vmem:[%s319_s1 + $0x8] sm:$0xff]  ;;  %v263_v7 = vmov 0.0   ;;  %vm145_vm2 = vcmask 130048   ;;  %vm219_vm3 = vcmask 64512  }
   0x2   :  { %v21_v1 = vld [vmem:[%s319_s1] sm:$0xff]  ;;  %235 = vmatprep.subr.msk.mxu0 %vm35_vm0, %v20_v0  ;;  %v24_v5 = vld [vmem:[%s320_s2 + $0x8] sm:$0xff]  ;;  %247 = vmatprep.subr.bf16.mxu1 %v261_v6 }
   0x3   :  { %237 = vmatprep.mubr.msk.f32.mxu0 %vm35_vm0, %v21_v1  ;;  %v23_v3 = vld [vmem:[%s320_s2] sm:$0xff]  ;;  %236 = vmatpush3.xpose.msk.msra.mxu0 %vm35_vm0, %v20_v0 }
   0x4   :  { %27 = vperm.xlu0 %254, %v23_v3   ;;  %244 = vmatprep.mubr.msk.f32.mxu1 %vm262_vm1, %v263_v7  ;;  %v139_v8 = vld [vmem:[%s321_s4] sm:$0xff] }
   0x5   :  { %142 = vperm.xlu1 %255, %v139_v8   ;;  %v138_v34 = vld [vmem:[%s322_s3] sm:$0xff] }
   0x6   :  { %238 = vmatmul.mubr.msk.f32.vlgmr.msra.gmra.mrb[0].mxu0 %vm35_vm0, %v22_v4 }
   0x8   :  { %32 = vperm.xlu0 %254, %v24_v5  }
  0x83   :  { %v28_v9 = vpop.permute.xlu0 %27 }
  0x84   :  { %v143_v35 = vpop.permute.xlu1 %142 }
  0x87   :  { %v33_v10 = vpop.permute.xlu0 %32 }
  0xd9   :  { %v239_v11 = vpop.f32.mrb[0].mxu0 }
  0xda   :  { %v117_v12 = vadd.f32 %v239_v11, %v33_v10  ;;  %v111_v13 = vpop.f32.mrb[1].mxu0 }
  0xdb   :  { %v112_v14 = vadd.f32 %v111_v13, %v28_v9 }
  0xdc   :  { %v123_v15 = vmul.f32 %v117_v12, %v117_v12  ;;  %v121_v27 = vmul.f32 0.5, %v117_v12 }
  0xdd   :  { %v122_v16 = vmul.f32 %v112_v14, %v112_v14  ;;  %v120_v29 = vmul.f32 0.5, %v112_v14 }
  0xde   :  { %v125_v17 = vmul.f32 %v123_v15, %v117_v12 }
  0xdf   :  { %v124_v18 = vmul.f32 %v122_v16, %v112_v14 }
  0xe0   :  { %v127_v19 = vmul.f32 0.044715, %v125_v17 }
  0xe1   :  { %v126_v20 = vmul.f32 0.044715, %v124_v18 }
  0xe2   :  { %v129_v21 = vadd.f32 %v127_v19, %v117_v12 }
  0xe3   :  { %v128_v22 = vadd.f32 %v126_v20, %v112_v14 }
  0xe4   :  { %v131_v23 = vmul.f32 0.7978846, %v129_v21 }
  0xe5   :  { %v130_v24 = vmul.f32 0.7978846, %v128_v22 }
  0xe6   :  { %256 = vtanh.f32 %v131_v23 }
  0xe7   :  { %258 = vtanh.f32 %v130_v24 }
  0xf0   :  { %v257_v25 = vpop.eup %256 }
  0xf1   :  { %v259_v26 = vpop.eup %258  ;;  %v135_v28 = vadd.f32 1.0, %v257_v25 }
  0xf2   :  { %v134_v30 = vadd.f32 1.0, %v259_v26 }
  0xf3   :  { %v137_v31 = vmul.f32 %v135_v28, %v121_v27 }
  0xf4   :  { %v136_v32 = vmul.f32 %v134_v30, %v120_v29 }
  0xf6   :  { %v248_v33 = vpack.c.bf16 %v137_v31, %v136_v32 }
  0xf8   :  { %249 = vmatpush3.bf16.msra.mxu1 %v248_v33 }
  0xfb   :  { %245 = vmatmul.mubr.msk.f32.vlgmr.msra.gmra.mrb[0].mxu1 %vm145_vm2, %v138_v34 }
 0x1ce   :  { %v215_v36 = vpop.f32.mrb[0].mxu1 }
 0x1cf   :  { %v216_v37 = vadd.f32 %v215_v36, %v143_v35  ;;  %v246_v38 = vpop.f32.mrb[1].mxu1 }
 0x1d1   :  { %220 = vst.msk [vmem:[%s323_s5] sm:$0xff] %vm219_vm3, %v216_v37 }

</bundles_post_ra>
